<compile_context>
chip_gen: v6e
topology: v6e:2x2x1
jax: 0.10.0
libtpu: 0.0.40
codegen_flags: <defaults>
</compile_context>

<pallas_src>
import functools

import jax
import jax.numpy as jnp
from jax import lax
from jax.experimental import pallas as pl
from jax.experimental.pallas import tpu as pltpu


def _regular_loss_kernel(*refs, gamma, num_parts, batch, tile_b, needs_mask):
    # refs = (part_0..part_{P-1}, out, acc_0..acc_{P-1})
    #   part_p : [tile_b, C] (native dtype) VMEM block of part p
    #   out    : (1, 1) f32 SMEM scalar output
    #   acc_p  : (1, C) f32 VMEM running channel-sum of normalized rows
    part_refs = refs[:num_parts]
    out_ref = refs[num_parts]
    acc_refs = refs[num_parts + 1:]

    b = pl.program_id(0)
    nb = pl.num_programs(0)

    @pl.when(b == 0)
    def _init():
        for p in range(num_parts):
            acc_refs[p][...] = jnp.zeros_like(acc_refs[p])

    if needs_mask:
        row_ids = (b * tile_b
                   + lax.broadcasted_iota(jnp.int32, (tile_b, 1), 0))
        valid = row_ids < batch

    # Per part: cast to f32, L2-normalize rows (rsqrt -> EUP slot), reduce over
    # the batch rows of this block, and accumulate into the [1, C] scratch.
    for p in range(num_parts):
        x = part_refs[p][...].astype(jnp.float32)                   # [tb, C]
        inv_norm = lax.rsqrt(jnp.sum(x * x, axis=1, keepdims=True))  # [tb, 1]
        xn = x * inv_norm
        if needs_mask:
            xn = jnp.where(valid, xn, jnp.float32(0.0))
        acc_refs[p][...] += jnp.sum(xn, axis=0, keepdims=True)       # [1, C]

    @pl.when(b == nb - 1)
    def _finalize():
        s_total = jnp.zeros_like(acc_refs[0])        # [1, C] sum_i s_i
        sq_vec = jnp.zeros_like(acc_refs[0])         # [1, C] sum_i s_i^2
        for p in range(num_parts):
            sp = acc_refs[p][...]
            s_total = s_total + sp
            sq_vec = sq_vec + sp * sp
        diff = (jnp.float32(0.5) * s_total * s_total
                - jnp.float32(1.5) * sq_vec)         # [1, C]
        inv_b2 = jnp.float32(1.0 / float(batch * batch))
        total = jnp.float32(num_parts) + jnp.sum(diff) * inv_b2
        out_ref[0, 0] = total * jnp.float32(gamma)


def _choose_tile_b(batch, channels, itemsize, num_parts,
                   budget_bytes=8 * 1024 * 1024):
    """Pick a batch tile that is sublane-aligned and keeps double-buffered
    blocks for all parts well under the per-generation scoped-VMEM limits."""
    sublane = 8 * max(1, 4 // itemsize)   # f32: 8, bf16: 16, int8/fp8: 32
    if batch <= sublane:
        return batch                       # full-array block is always legal
    per_row = 2 * num_parts * channels * itemsize
    max_rows = max(sublane, budget_bytes // max(per_row, 1))
    tile = min(batch, 512, max_rows)
    tile = max(sublane, (tile // sublane) * sublane)
    return batch if tile >= batch else tile


def regular_loss(parts, gamma, *, tile_b=None):
    """parts: list of arrays, each [B, C, 1, 1] (or [B, C]); returns scalar loss."""
    parts2d = [p.reshape(p.shape[0], p.shape[1]) for p in parts]  # native dtype
    num_parts = len(parts2d)
    B, C = parts2d[0].shape
    itemsize = jnp.dtype(parts2d[0].dtype).itemsize

    if tile_b is None:
        tile_b = _choose_tile_b(B, C, itemsize, num_parts)
    tile_b = int(min(tile_b, B))
    num_blocks = int(pl.cdiv(B, tile_b))
    needs_mask = (num_blocks * tile_b) != B

    kern = functools.partial(
        _regular_loss_kernel, gamma=float(gamma), num_parts=num_parts,
        batch=B, tile_b=tile_b, needs_mask=needs_mask)

    part_bytes = sum(int(p.size) * itemsize for p in parts2d)
    vmem_needed = num_parts * (2 * tile_b * C * itemsize + C * 4) + (2 << 20)
    vmem_limit = int(min(max(vmem_needed, 4 << 20), 64 << 20))

    out = pl.pallas_call(
        kern,
        out_shape=jax.ShapeDtypeStruct((1, 1), jnp.float32),
        grid_spec=pltpu.PrefetchScalarGridSpec(
            num_scalar_prefetch=0,
            grid=(num_blocks,),
            in_specs=[pl.BlockSpec((tile_b, C), lambda b: (b, 0))
                      for _ in range(num_parts)],
            out_specs=pl.BlockSpec((1, 1), lambda b: (0, 0),
                                   memory_space=pltpu.SMEM),
            scratch_shapes=[pltpu.VMEM((1, C), jnp.float32)
                            for _ in range(num_parts)]),
        compiler_params=pltpu.CompilerParams(
            dimension_semantics=("arbitrary",),   # accumulating axis
            vmem_limit_bytes=vmem_limit),
        cost_estimate=pl.CostEstimate(
            flops=4 * num_parts * B * C,
            transcendentals=num_parts * B,
            bytes_accessed=part_bytes + 4),
    )(*parts2d)
    return out[0, 0]


def _reference_loss(parts, gamma):
    """Pure-JAX reference mirroring the PyTorch code (full P x P loop + triu)."""
    xs = [p.reshape(p.shape[0], p.shape[1]).astype(jnp.float32) for p in parts]
    xs = [x / jnp.linalg.norm(x, axis=1, keepdims=True) for x in xs]
    P = len(xs)
    corr = jnp.zeros((P, P), jnp.float32)
    for i in range(P):
        for j in range(P):
            m = jnp.mean(xs[i] @ xs[j].T)
            if i == j:
                m = 1.0 - m
            corr = corr.at[i, j].set(m)
    return jnp.sum(jnp.triu(corr)) * gamma


if __name__ == "__main__":
    key = jax.random.PRNGKey(0)
    # Small but lane-dense shapes; B not a multiple of the tile so the
    # grid + partial-block masking path is exercised.
    num_parts, B, C = 3, 12, 128
    gamma = 0.5

    keys = jax.random.split(key, num_parts)
    parts = [jax.random.normal(k, (B, C, 1, 1), dtype=jnp.float32)
             for k in keys]

    ref = _reference_loss(parts, gamma)

    # Grid of 2 blocks (tile_b=8) with a masked partial last block.
    loss = regular_loss(parts, gamma, tile_b=8)
    jax.block_until_ready(loss)
    assert jnp.allclose(loss, ref, atol=1e-4, rtol=1e-4), (loss, ref)

    # Default tile heuristic (single full-array block at this size).
    loss2 = regular_loss(parts, gamma)
    jax.block_until_ready(loss2)
    assert jnp.allclose(loss2, ref, atol=1e-4, rtol=1e-4), (loss2, ref)

    print("KERNEL_OK")
</pallas_src>

<mosaic_0001>
module attributes {stable_mosaic.version = 11 : i64} {
  func.func @_regular_loss_kernel(%arg0: i32, %arg1: memref<8x128xf32, #tpu.memory_space<vmem>>, %arg2: memref<8x128xf32, #tpu.memory_space<vmem>>, %arg3: memref<8x128xf32, #tpu.memory_space<vmem>>, %arg4: memref<1x1xf32, #tpu.memory_space<smem>>, %arg5: memref<1x128xf32, #tpu.memory_space<vmem>>, %arg6: memref<1x128xf32, #tpu.memory_space<vmem>>, %arg7: memref<1x128xf32, #tpu.memory_space<vmem>>) attributes {dimension_semantics = [#tpu.dimension_semantics<arbitrary>], iteration_bounds = array<i64: 2>, scalar_prefetch = 0 : i64, scratch_operands = 3 : i64, tpu.core_type = #tpu.core_type<tc>, window_params = [{transform_indices = @transform_0, window_bounds = array<i64: 8, 128>}, {transform_indices = @transform_1, window_bounds = array<i64: 8, 128>}, {transform_indices = @transform_2, window_bounds = array<i64: 8, 128>}, {transform_indices = @transform_3, window_bounds = array<i64: 1, 1>}]} {
    %c0_i32 = arith.constant 0 : i32
    %0 = arith.cmpi eq, %arg0, %c0_i32 : i32
    %1 = arith.extui %0 : i1 to i32
    %c0_i32_0 = arith.constant 0 : i32
    %2 = arith.cmpi ne, %1, %c0_i32_0 : i32
    scf.if %2 {
      %cst_27 = arith.constant 0.000000e+00 : f32
      %60 = vector.broadcast %cst_27 : f32 to vector<1x128xf32>
      %c0_28 = arith.constant 0 : index
      %c0_29 = arith.constant 0 : index
      %61 = vector.load %arg5[%c0_28, %c0_29] : memref<1x128xf32, #tpu.memory_space<vmem>>, vector<1x128xf32>
      tpu.vector_store %arg5[%c0_28, %c0_29], %60 {strides = array<i32>} : memref<1x128xf32, #tpu.memory_space<vmem>>, vector<1x128xf32>,
      %cst_30 = arith.constant 0.000000e+00 : f32
      %62 = vector.broadcast %cst_30 : f32 to vector<1x128xf32>
      %c0_31 = arith.constant 0 : index
      %c0_32 = arith.constant 0 : index
      %63 = vector.load %arg6[%c0_31, %c0_32] : memref<1x128xf32, #tpu.memory_space<vmem>>, vector<1x128xf32>
      tpu.vector_store %arg6[%c0_31, %c0_32], %62 {strides = array<i32>} : memref<1x128xf32, #tpu.memory_space<vmem>>, vector<1x128xf32>,
      %cst_33 = arith.constant 0.000000e+00 : f32
      %64 = vector.broadcast %cst_33 : f32 to vector<1x128xf32>
      %c0_34 = arith.constant 0 : index
      %c0_35 = arith.constant 0 : index
      %65 = vector.load %arg7[%c0_34, %c0_35] : memref<1x128xf32, #tpu.memory_space<vmem>>, vector<1x128xf32>
      tpu.vector_store %arg7[%c0_34, %c0_35], %64 {strides = array<i32>} : memref<1x128xf32, #tpu.memory_space<vmem>>, vector<1x128xf32>,
    } else {
    }
    %c8_i32 = arith.constant 8 : i32
    %3 = arith.muli %arg0, %c8_i32 : i32
    %4 = tpu.iota {dimensions = array<i32: 0>} : vector<8x1xi32>
    %5 = vector.broadcast %3 : i32 to vector<8x1xi32>
    %6 = arith.addi %5, %4 : vector<8x1xi32>
    %c12_i32 = arith.constant 12 : i32
    %7 = vector.broadcast %c12_i32 : i32 to vector<8x1xi32>
    %8 = arith.cmpi slt, %6, %7 : vector<8x1xi32>
    %c0 = arith.constant 0 : index
    %c0_1 = arith.constant 0 : index
    %9 = vector.load %arg1[%c0, %c0_1] : memref<8x128xf32, #tpu.memory_space<vmem>>, vector<8x128xf32>
    %10 = arith.mulf %9, %9 : vector<8x128xf32>
    %cst = arith.constant dense<0.000000e+00> : vector<8xf32>
    %11 = vector.multi_reduction <add>, %10, %cst [1] : vector<8x128xf32> to vector<8xf32>
    %12 = vector.shape_cast %11 : vector<8xf32> to vector<8x1xf32>
    %13 = math.rsqrt %12 : vector<8x1xf32>
    %14 = vector.broadcast %13 : vector<8x1xf32> to vector<8x128xf32>
    %15 = arith.mulf %9, %14 : vector<8x128xf32>
    %cst_2 = arith.constant 0.000000e+00 : f32
    %16 = vector.shape_cast %8 : vector<8x1xi1> to vector<8x1xi1>
    %17 = vector.broadcast %16 : vector<8x1xi1> to vector<8x128xi1>
    %18 = vector.broadcast %cst_2 : f32 to vector<8x128xf32>
    %19 = arith.select %17, %15, %18 : vector<8x128xi1>, vector<8x128xf32>
    %c0_3 = arith.constant 0 : index
    %c0_4 = arith.constant 0 : index
    %20 = vector.load %arg5[%c0_3, %c0_4] : memref<1x128xf32, #tpu.memory_space<vmem>>, vector<1x128xf32>
    %cst_5 = arith.constant dense<0.000000e+00> : vector<128xf32>
    %21 = vector.multi_reduction <add>, %19, %cst_5 [0] : vector<8x128xf32> to vector<128xf32>
    %22 = vector.shape_cast %21 : vector<128xf32> to vector<1x128xf32>
    %23 = arith.addf %20, %22 : vector<1x128xf32>
    %c0_6 = arith.constant 0 : index
    %c0_7 = arith.constant 0 : index
    %24 = vector.load %arg5[%c0_6, %c0_7] : memref<1x128xf32, #tpu.memory_space<vmem>>, vector<1x128xf32>
    tpu.vector_store %arg5[%c0_6, %c0_7], %23 {strides = array<i32>} : memref<1x128xf32, #tpu.memory_space<vmem>>, vector<1x128xf32>,
    %c0_8 = arith.constant 0 : index
    %c0_9 = arith.constant 0 : index
    %25 = vector.load %arg2[%c0_8, %c0_9] : memref<8x128xf32, #tpu.memory_space<vmem>>, vector<8x128xf32>
    %26 = arith.mulf %25, %25 : vector<8x128xf32>
    %cst_10 = arith.constant dense<0.000000e+00> : vector<8xf32>
    %27 = vector.multi_reduction <add>, %26, %cst_10 [1] : vector<8x128xf32> to vector<8xf32>
    %28 = vector.shape_cast %27 : vector<8xf32> to vector<8x1xf32>
    %29 = math.rsqrt %28 : vector<8x1xf32>
    %30 = vector.broadcast %29 : vector<8x1xf32> to vector<8x128xf32>
    %31 = arith.mulf %25, %30 : vector<8x128xf32>
    %cst_11 = arith.constant 0.000000e+00 : f32
    %32 = vector.shape_cast %8 : vector<8x1xi1> to vector<8x1xi1>
    %33 = vector.broadcast %32 : vector<8x1xi1> to vector<8x128xi1>
    %34 = vector.broadcast %cst_11 : f32 to vector<8x128xf32>
    %35 = arith.select %33, %31, %34 : vector<8x128xi1>, vector<8x128xf32>
    %c0_12 = arith.constant 0 : index
    %c0_13 = arith.constant 0 : index
    %36 = vector.load %arg6[%c0_12, %c0_13] : memref<1x128xf32, #tpu.memory_space<vmem>>, vector<1x128xf32>
    %cst_14 = arith.constant dense<0.000000e+00> : vector<128xf32>
    %37 = vector.multi_reduction <add>, %35, %cst_14 [0] : vector<8x128xf32> to vector<128xf32>
    %38 = vector.shape_cast %37 : vector<128xf32> to vector<1x128xf32>
    %39 = arith.addf %36, %38 : vector<1x128xf32>
    %c0_15 = arith.constant 0 : index
    %c0_16 = arith.constant 0 : index
    %40 = vector.load %arg6[%c0_15, %c0_16] : memref<1x128xf32, #tpu.memory_space<vmem>>, vector<1x128xf32>
    tpu.vector_store %arg6[%c0_15, %c0_16], %39 {strides = array<i32>} : memref<1x128xf32, #tpu.memory_space<vmem>>, vector<1x128xf32>,
    %c0_17 = arith.constant 0 : index
    %c0_18 = arith.constant 0 : index
    %41 = vector.load %arg3[%c0_17, %c0_18] : memref<8x128xf32, #tpu.memory_space<vmem>>, vector<8x128xf32>
    %42 = arith.mulf %41, %41 : vector<8x128xf32>
    %cst_19 = arith.constant dense<0.000000e+00> : vector<8xf32>
    %43 = vector.multi_reduction <add>, %42, %cst_19 [1] : vector<8x128xf32> to vector<8xf32>
    %44 = vector.shape_cast %43 : vector<8xf32> to vector<8x1xf32>
    %45 = math.rsqrt %44 : vector<8x1xf32>
    %46 = vector.broadcast %45 : vector<8x1xf32> to vector<8x128xf32>
    %47 = arith.mulf %41, %46 : vector<8x128xf32>
    %cst_20 = arith.constant 0.000000e+00 : f32
    %48 = vector.shape_cast %8 : vector<8x1xi1> to vector<8x1xi1>
    %49 = vector.broadcast %48 : vector<8x1xi1> to vector<8x128xi1>
    %50 = vector.broadcast %cst_20 : f32 to vector<8x128xf32>
    %51 = arith.select %49, %47, %50 : vector<8x128xi1>, vector<8x128xf32>
    %c0_21 = arith.constant 0 : index
    %c0_22 = arith.constant 0 : index
    %52 = vector.load %arg7[%c0_21, %c0_22] : memref<1x128xf32, #tpu.memory_space<vmem>>, vector<1x128xf32>
    %cst_23 = arith.constant dense<0.000000e+00> : vector<128xf32>
    %53 = vector.multi_reduction <add>, %51, %cst_23 [0] : vector<8x128xf32> to vector<128xf32>
    %54 = vector.shape_cast %53 : vector<128xf32> to vector<1x128xf32>
    %55 = arith.addf %52, %54 : vector<1x128xf32>
    %c0_24 = arith.constant 0 : index
    %c0_25 = arith.constant 0 : index
    %56 = vector.load %arg7[%c0_24, %c0_25] : memref<1x128xf32, #tpu.memory_space<vmem>>, vector<1x128xf32>
    tpu.vector_store %arg7[%c0_24, %c0_25], %55 {strides = array<i32>} : memref<1x128xf32, #tpu.memory_space<vmem>>, vector<1x128xf32>,
    %c1_i32 = arith.constant 1 : i32
    %57 = arith.cmpi eq, %arg0, %c1_i32 : i32
    %58 = arith.extui %57 : i1 to i32
    %c0_i32_26 = arith.constant 0 : i32
    %59 = arith.cmpi ne, %58, %c0_i32_26 : i32
    scf.if %59 {
      %cst_27 = arith.constant 0.000000e+00 : f32
      %60 = vector.broadcast %cst_27 : f32 to vector<1x128xf32>
      %cst_28 = arith.constant 0.000000e+00 : f32
      %61 = vector.broadcast %cst_28 : f32 to vector<1x128xf32>
      %c0_29 = arith.constant 0 : index
      %c0_30 = arith.constant 0 : index
      %62 = vector.load %arg5[%c0_29, %c0_30] : memref<1x128xf32, #tpu.memory_space<vmem>>, vector<1x128xf32>
      %63 = arith.addf %60, %62 : vector<1x128xf32>
      %64 = arith.mulf %62, %62 : vector<1x128xf32>
      %65 = arith.addf %61, %64 : vector<1x128xf32>
      %c0_31 = arith.constant 0 : index
      %c0_32 = arith.constant 0 : index
      %66 = vector.load %arg6[%c0_31, %c0_32] : memref<1x128xf32, #tpu.memory_space<vmem>>, vector<1x128xf32>
      %67 = arith.addf %63, %66 : vector<1x128xf32>
      %68 = arith.mulf %66, %66 : vector<1x128xf32>
      %69 = arith.addf %65, %68 : vector<1x128xf32>
      %c0_33 = arith.constant 0 : index
      %c0_34 = arith.constant 0 : index
      %70 = vector.load %arg7[%c0_33, %c0_34] : memref<1x128xf32, #tpu.memory_space<vmem>>, vector<1x128xf32>
      %71 = arith.addf %67, %70 : vector<1x128xf32>
      %72 = arith.mulf %70, %70 : vector<1x128xf32>
      %73 = arith.addf %69, %72 : vector<1x128xf32>
      %cst_35 = arith.constant 5.000000e-01 : f32
      %74 = vector.broadcast %cst_35 : f32 to vector<1x128xf32>
      %75 = arith.mulf %74, %71 : vector<1x128xf32>
      %76 = arith.mulf %75, %71 : vector<1x128xf32>
      %cst_36 = arith.constant 1.500000e+00 : f32
      %77 = vector.broadcast %cst_36 : f32 to vector<1x128xf32>
      %78 = arith.mulf %77, %73 : vector<1x128xf32>
      %79 = arith.subf %76, %78 : vector<1x128xf32>
      %80 = vector.shape_cast %79 : vector<1x128xf32> to vector<1x1x128xf32>
      %cst_37 = arith.constant dense<0.000000e+00> : vector<1xf32>
      %81 = vector.multi_reduction <add>, %80, %cst_37 [1, 2] : vector<1x1x128xf32> to vector<1xf32>
      %82 = vector.shape_cast %81 : vector<1xf32> to vector<1x1x1xf32>
      %83 = vector.extract %82[0, 0, 0] : f32 from vector<1x1x1xf32>
      %cst_38 = arith.constant 0.0069444445 : f32
      %84 = arith.mulf %83, %cst_38 : f32
      %cst_39 = arith.constant 3.000000e+00 : f32
      %85 = arith.addf %cst_39, %84 : f32
      %cst_40 = arith.constant 5.000000e-01 : f32
      %86 = arith.mulf %85, %cst_40 : f32
      %c0_41 = arith.constant 0 : index
      %c0_42 = arith.constant 0 : index
      %87 = memref.load %arg4[%c0_41, %c0_42] : memref<1x1xf32, #tpu.memory_space<smem>>
      memref.store %86, %arg4[%c0_41, %c0_42] : memref<1x1xf32, #tpu.memory_space<smem>>
    } else {
    }
    return
  }
  func.func @transform_0(%arg0: i32) -> (i32, i32) {
    %c0_i32 = arith.constant 0 : i32
    %c0_i32_0 = arith.constant 0 : i32
    return %arg0, %c0_i32 : i32, i32
  }
  func.func @transform_1(%arg0: i32) -> (i32, i32) {
    %c0_i32 = arith.constant 0 : i32
    %c0_i32_0 = arith.constant 0 : i32
    return %arg0, %c0_i32 : i32, i32
  }
  func.func @transform_2(%arg0: i32) -> (i32, i32) {
    %c0_i32 = arith.constant 0 : i32
    %c0_i32_0 = arith.constant 0 : i32
    return %arg0, %c0_i32 : i32, i32
  }
  func.func @transform_3(%arg0: i32) -> (i32, i32) {
    %c0_i32 = arith.constant 0 : i32
    %c0_i32_0 = arith.constant 0 : i32
    %c0_i32_1 = arith.constant 0 : i32
    return %c0_i32, %c0_i32_0 : i32, i32
  }
}

</mosaic_0001>

<bundles_post_ra>
// kernel: tpu_custom_call.1
= control target key start
LH: loop header
LB: loop body
LE: loop exit
PB: predicated region body
PF: predicated region fallthrough
CT: control target
= control target key end

     0   :  { %8 = vsyncpa [#allocation6], 0  ;;  %s867_s0 = inlined_call_operand.hbm [shape: f32[12,128], index: 0, kind: input, shape index: {}]   ;;  %s868_s1 = inlined_call_operand.hbm [shape: f32[12,128], index: 1, kind: input, shape index: {}]   ;;  %s869_s2 = inlined_call_operand.hbm [shape: f32[12,128], index: 2, kind: input, shape index: {}]   ;;  %s870_s3 = inlined_call_operand.hbm [shape: f32[1,1], index: 3, kind: output, shape index: {}]  }
   0x1   :  { %10 = vsyncpa [#allocation6 + $0x1], 0 }
   0x2   :  { %11 = vsyncpa [#allocation9], 0 }
   0x3   :  { %13 = vsyncpa [#allocation9 + $0x1], 0 }
   0x4   :  { %14 = vsyncpa [#allocation7], 0  ;;  %s691_s12 = smov 0   ;;  %s693_s13 = smov 0  }
   0x5   :  { %s695_s14 = smov 0   ;;  %s697_s15 = smov 0  }
   0x6 LB: > { %s710_s16 = sadd.s32 4294967295, %s664_s15   ;;  %s713_s17 = sadd.s32 1, %s664_s15   ;;  %s664_s15 = sphi %s697_s15, %s883_s15   ;;  %s660_s14 = sphi %s695_s14, %s882_s14   ;;  %s656_s13 = sphi %s693_s13, %s881_s13   ;;  %s652_s12 = sphi %s691_s12, %s880_s12  }
   0x7   : > { %s24_s18 = ssub.s32 %s664_s15, %s713_s17  ;;  %s27_s19 = sadd.s32 1, %s660_s14 }
   0x8   : > { %p25_p0 = scmp.eq.s32.totalorder %s24_s18, 0  ;;  %p34_p1 = scmp.ne.s32.totalorder %s660_s14, %s656_s13 }
   0x9   : > { %p35_p2 = scmp.eq.s32.totalorder %s664_s15, 0  ;;  %p40_p3 = scmp.ne.s32.totalorder %s656_s13, %s652_s12 }
   0xa   : > { %s723_s20 = scalar_select %p25_p0, %s660_s14, %s27_s19  }
   0xb   : > { %p36_p4 = por %p35_p2, %p34_p1  ;;  %p41_p5 = scmp.eq.s32.totalorder %s710_s16, 0 }
   0xc   : > { %p485_p6 = scmp.lt.s32.totalorder %s664_s15, 2  ;;  %s137_s22 = sand.u32 1, %s660_s14  }
   0xd   : > { %p727_p7 = por %p41_p5, %p40_p3  ;;  %s734_s23 = sshll.u32 %s137_s22, 3 }
   0xe   : > { %s737_s24 = sshll.u32 %s664_s15, 7  ;;  %p739_p8 = pnand %p485_p6, %p36_p4 }
   0xf   : > { %s872_s21 = scalar_select %p727_p7, 1, 0 }
  0x10   : > { %s155_s26 = sand.u32 1, %s664_s15   ;;  %s748_s29 = scalar_lea.hbm %s868_s1, %s737_s24 }
  0x11   : > { %s159_s30 = scalar_lea.vmem [#allocation8], %s734_s23  ;;  %s753_s5 = scalar_lea.sflag [#allocation9], %s155_s26 }
  0x12   : > { %s166_s4 = sshll.u32 %s159_s30, 4  ;;  %s528_s6 = scalar_lea.hbm %s748_s29, 128  ;;  %s167_s4 = int_to_ptr.vmem [resolvable:$true] %s166_s4 }
  0x13   : > { %p529_p11 = scmp.ne.s32.totalorder %s748_s29, %s528_s6  ;;  %p759_p12 = pneg %p739_p8 }
  0x14   : > { %s533_s10 = scalar_lea.hbm %s868_s1, 256  ;;  %p534_p1 = scmp.lt.s32.totalorder %s748_s29, %s868_s1 }
  0x15   : > { %p531_p13 = pnand %p759_p12, %p529_p11  ;;  %p535_p2 = scmp.lt.s32.totalorder %s533_s10, %s528_s6 }
  0x17   : > { %p532_p0 = pneg %p531_p13  ;;  %p536_p3 = por %p535_p2, %p534_p1 }
  0x19   : > { %p537_p4 = pnand %p536_p3, %p532_p0 }
  0x1b   : > { %540 = shalt.err (!%p537_p4)
}
  0x1c   : > { %s541_s18 = scalar_lea.vmem %s167_s4, 128  ;;  %s666_s19 = smov [#allocation8]  }
  0x1d   : > { %p542_p5 = scmp.ne.s32.totalorder %s167_s4, %s541_s18  ;;  %s546_s26 = sshll.u32 %s666_s19, 4  ;;  %s547_s26 = int_to_ptr.vmem [resolvable:$false] %s546_s26 }
  0x1e   : > { %s548_s27 = scalar_lea.vmem %s547_s26, 256  ;;  %p549_p11 = scmp.lt.s32.totalorder %s167_s4, %s547_s26 }
  0x1f   : > { %p544_p6 = pnand %p542_p5, %p759_p12  ;;  %p550_p13 = scmp.lt.s32.totalorder %s548_s27, %s541_s18 }
  0x21   : > { %p545_p9 = pneg %p544_p6  ;;  %p551_p10 = por %p550_p13, %p549_p11 }
  0x23   : > { %p552_p7 = pnand %p551_p10, %p545_p9 }
  0x25   : > { %555 = shalt.err (!%p552_p7)
}
  0x26   : > { %481 = dma.hbm_to_vmem [thread:$0]  (!%p739_p8), %s748_s29, 128, %s167_s4, %s753_s5  }
  0x27   : > { %p875_p0 = scmp.lt.s32.totalorder %s664_s15, 3  ;;  %p876_p1 = scmp.ge.s32.totalorder %s664_s15, 1 }
  0x28   : > { %s790_s8 = scalar_lea.hbm %s867_s0, %s737_s24  ;;  %s141_s9 = scalar_lea.vmem [#allocation5], %s734_s23 }
  0x29   : > { %p782_p2 = pnand %p876_p1, %p875_p0  ;;  %s148_s10 = sshll.u32 %s141_s9, 4  ;;  %s149_s10 = int_to_ptr.vmem [resolvable:$true] %s148_s10 }
  0x2a   : > { %s797_s29 = scalar_lea.hbm %s869_s2, %s737_s24  ;;  %s138_s15 = scalar_lea.sflag [#allocation6], %s137_s22 }
  0x2b   : > { %s877_s28 = scalar_select %p782_p2, 1, 0 }
  0x2c   : > { %s556_s4 = scalar_lea.hbm %s790_s8, 128  ;;  %s561_s26 = scalar_lea.hbm %s867_s0, 256 }
  0x2d   : > { %p557_p7 = scmp.ne.s32.totalorder %s790_s8, %s556_s4  ;;  %p562_p3 = scmp.lt.s32.totalorder %s790_s8, %s867_s0 }
  0x2e   : > { %p563_p4 = scmp.lt.s32.totalorder %s561_s26, %s556_s4 }
  0x2f   : > { %p559_p9 = pnand %p557_p7, %p759_p12 }
  0x30   : > { %p564_p5 = por %p563_p4, %p562_p3 }
  0x31   : > { %p560_p10 = pneg %p559_p9 }
  0x33   : > { %p565_p6 = pnand %p564_p5, %p560_p10 }
  0x35   : > { %568 = shalt.err (!%p565_p6)
}
  0x36   : > { %s569_s24 = scalar_lea.vmem %s149_s10, 128  ;;  %s667_s22 = smov [#allocation5]  }
  0x37   : > { %p570_p11 = scmp.ne.s32.totalorder %s149_s10, %s569_s24  ;;  %s574_s6 = sshll.u32 %s667_s22, 4  ;;  %s575_s6 = int_to_ptr.vmem [resolvable:$false] %s574_s6 }
  0x38   : > { %s576_s9 = scalar_lea.vmem %s575_s6, 256  ;;  %p577_p1 = scmp.lt.s32.totalorder %s149_s10, %s575_s6 }
  0x39   : > { %p572_p13 = pnand %p570_p11, %p759_p12  ;;  %p578_p7 = scmp.lt.s32.totalorder %s576_s9, %s569_s24 }
  0x3b   : > { %p573_p0 = pneg %p572_p13  ;;  %p579_p9 = por %p578_p7, %p577_p1 }
  0x3d   : > { %p580_p2 = pnand %p579_p9, %p573_p0 }
  0x3f   : > { %583 = shalt.err (!%p580_p2)
}
  0x40   : > { %478 = dma.hbm_to_vmem [thread:$0]  (!%p739_p8), %s790_s8, 128, %s149_s10, %s138_s15  }
  0x41   : > { %s177_s11 = scalar_lea.vmem [#allocation10], %s734_s23  ;;  %s584_s4 = scalar_lea.hbm %s797_s29, 128 }
  0x42   : > { %s184_s12 = sshll.u32 %s177_s11, 4  ;;  %p585_p10 = scmp.ne.s32.totalorder %s797_s29, %s584_s4  ;;  %s185_s12 = int_to_ptr.vmem [resolvable:$true] %s184_s12 }
  0x43   : > { %s589_s26 = scalar_lea.hbm %s869_s2, 256  ;;  %p590_p2 = scmp.lt.s32.totalorder %s797_s29, %s869_s2 }
  0x44   : > { %p587_p3 = pnand %p585_p10, %p759_p12  ;;  %p591_p5 = scmp.lt.s32.totalorder %s589_s26, %s584_s4 }
  0x46   : > { %p588_p4 = pneg %p587_p3  ;;  %p592_p6 = por %p591_p5, %p590_p2 }
  0x48   : > { %p593_p11 = pnand %p592_p6, %p588_p4 }
  0x4a   : > { %596 = shalt.err (!%p593_p11)
}
  0x4b   : > { %s597_s23 = scalar_lea.vmem %s185_s12, 128  ;;  %s668_s8 = smov [#allocation10]  }
  0x4c   : > { %p598_p13 = scmp.ne.s32.totalorder %s185_s12, %s597_s23  ;;  %s602_s10 = sshll.u32 %s668_s8, 4  ;;  %s603_s10 = int_to_ptr.vmem [resolvable:$false] %s602_s10 }
  0x4d   : > { %s604_s15 = scalar_lea.vmem %s603_s10, 256  ;;  %p605_p7 = scmp.lt.s32.totalorder %s185_s12, %s603_s10 }
  0x4e   : > { %p600_p0 = pnand %p598_p13, %p759_p12  ;;  %p606_p9 = scmp.lt.s32.totalorder %s604_s15, %s597_s23 }
  0x50   : > { %p601_p1 = pneg %p600_p0  ;;  %p607_p10 = por %p606_p9, %p605_p7 }
  0x52   : > { %p608_p3 = pnand %p607_p10, %p601_p1 }
  0x54   : > { %611 = shalt.err (!%p608_p3)
}
  0x55   : > { %484 = dma.hbm_to_vmem [thread:$0]  (!%p739_p8), %s797_s29, 128, %s185_s12, %s753_s5  }
  0x56   : > { %p878_p4 = scmp.ne.s32.totalorder %s877_s28, 0 }
  0x57   : > { %s195_s7 = sand.u32 (!%p878_p4), 1, %s656_s13   ;;  %p879_p12 = scmp.ne.s32.totalorder (!%p878_p4), %s872_s21, 0 }
  0x58   : > { %193 = sbr.rel (%p878_p4) target bundleno = 516 (0x204), region = 32  ;;  %s453_s24 = sshll.u32 (!%p878_p4), %s195_s7, 3 }
  0x59   : > { %s196_s22 = scalar_lea.sflag (!%p878_p4), [#allocation6], %s195_s7  ;;  %s199_s6 = scalar_lea.vmem (!%p878_p4), [#allocation5], %s453_s24 }
  0x5d   : > { %639 = dma.done.wait (%p879_p12), %s196_s22, 128  }
  0x5e   : > { %641 = vsyncadd (%p879_p12), %s196_s22, 4294967168  ;;  %s204_s25 = sand.u32 1, %s710_s16   ;;  %s208_s11 = scalar_lea.vmem [#allocation8], %s453_s24 }
  0x5f   : > { %s205_s9 = scalar_lea.sflag [#allocation9], %s204_s25 }
  0x60   : > { %643 = dma.done.wait (%p879_p12), %s205_s9, 256  }
  0x61   : > { %645 = vsyncadd (%p879_p12), %s205_s9, 4294967040  ;;  %s217_s5 = scalar_lea.vmem [#allocation10], %s453_s24  ;;  %p456_p8 = scmp.ne.s32.totalorder %s710_s16, 0 }
  0x63   : > { %248 = sbr.rel (%p456_p8) target bundleno = 107 (0x6b), region = 48 }
  0x68   : > { %v669_v0 = vmov 0.0  }
  0x69   : > { %249 = vst [vmem:[#allocation2] sm:$0x1] %v669_v0  ;;  %250 = vst [vmem:[#allocation3] sm:$0x1] %v669_v0 }
  0x6a   : > { %251 = vst [vmem:[#allocation4] sm:$0x1] %v669_v0 }
  0x6b PF: > { %v292_v1 = vld [vmem:[%s217_s5] sm:$0xff]  ;;  %v276_v3 = vld [vmem:[%s208_s11] sm:$0xff]  ;;  %v253_v9 = vlaneseq  ;;  %s457_s21 = sshll.u32 %s710_s16, 3  ;;  %p458_p2 = scmp.ne.s32.totalorder %s710_s16, 1 }
  0x6c   : > { %v258_v2 = vld [vmem:[%s199_s6] sm:$0xff]  ;;  %v293_v4 = vmul.f32 %v292_v1, %v292_v1  ;;  %v277_v6 = vmul.f32 %v276_v3, %v276_v3  ;;  %v255_v12 = vstv %s457_s21 }
  0x6d   : > { %v259_v5 = vmul.f32 %v258_v2, %v258_v2  ;;  %v254_v11 = vshrl.u32 %v253_v9, 7 }
  0x6e   : > { %294 = vadd.xlane.f32.xlu1 %v293_v4 }
  0x6f   : > { %260 = vadd.xlane.f32.xlu0 %v259_v5  ;;  %v256_v13 = vadd.s32 %v255_v12, %v254_v11 }
  0x70   : > { %v267_v38 = vld [vmem:[#allocation2] sm:$0x1]  ;;  %v283_v44 = vld [vmem:[#allocation3] sm:$0x1] }
  0x71   : > { %vm257_vm0 = vcmp.lt.s32.totalorder %v256_v13, 12  ;;  %v299_v35 = vld [vmem:[#allocation4] sm:$0x1] }
  0x73   : > { %278 = vadd.xlane.f32.xlu0 %v277_v6 }
  0xf7   : > { %v295_v7 = vpop.xlane.xlu1 %294 }
  0xf8   : > { %v261_v8 = vpop.xlane.xlu0 %260  ;;  %522 = vrsqrt.f32 %v295_v7 }
  0xf9   : > { %524 = vrsqrt.f32 %v261_v8 }
  0xfc   : > { %v279_v10 = vpop.xlane.xlu0 %278 }
  0xfd   : > { %526 = vrsqrt.f32 %v279_v10 }
 0x105   : > { %v523_v14 = vpop.eup %522 }
 0x106   : > { %v525_v15 = vpop.eup %524  ;;  %v297_v16 = vmul.f32 %v523_v14, %v292_v1 }
 0x107   : > { %v263_v17 = vmul.f32 %v525_v15, %v258_v2 }
 0x108   : > { %v298_v18 = vsel %vm257_vm0, %v297_v16, 0.0 }
 0x109   : > { %v300_v20 = vrot.slane %v298_v18, 4  ;;  %v266_v21 = vsel %vm257_vm0, %v263_v17, 0.0 }
 0x10a   : > { %v527_v19 = vpop.eup %526  ;;  %v268_v22 = vrot.slane %v266_v21, 4 }
 0x10b   : > { %v281_v23 = vmul.f32 %v527_v19, %v276_v3  ;;  %v301_v24 = vadd.f32 %v300_v20, %v298_v18 }
 0x10c   : > { %v269_v25 = vadd.f32 %v268_v22, %v266_v21 }
 0x10d   : > { %v282_v26 = vsel %vm257_vm0, %v281_v23, 0.0  ;;  %v302_v27 = vrot.slane %v301_v24, 2 }
 0x10e   : > { %v284_v28 = vrot.slane %v282_v26, 4  ;;  %v270_v29 = vrot.slane %v269_v25, 2 }
 0x10f   : > { %v303_v30 = vadd.f32 %v302_v27, %v301_v24 }
 0x110   : > { %v285_v31 = vadd.f32 %v284_v28, %v282_v26  ;;  %v271_v32 = vadd.f32 %v270_v29, %v269_v25 }
 0x111   : > { %v304_v33 = vrot.slane %v303_v30, 1 }
 0x112   : > { %v286_v34 = vrot.slane %v285_v31, 2  ;;  %v272_v36 = vrot.slane %v271_v32, 1 }
 0x113   : > { %v305_v37 = vadd.f32 %v304_v33, %v303_v30 }
 0x114   : > { %v287_v39 = vadd.f32 %v286_v34, %v285_v31  ;;  %v273_v40 = vadd.f32 %v272_v36, %v271_v32 }
 0x115   : > { %v306_v41 = vadd.f32 %v305_v37, %v299_v35 }
 0x116   : > { %v288_v42 = vrot.slane %v287_v39, 1  ;;  %v274_v43 = vadd.f32 %v273_v40, %v267_v38 }
 0x117   : > { %307 = vst [vmem:[#allocation4] sm:$0x1] %v306_v41 }
 0x118   : > { %v289_v45 = vadd.f32 %v288_v42, %v287_v39  ;;  %275 = vst [vmem:[#allocation2] sm:$0x1] %v274_v43  ;;  %311 = sbr.rel (%p458_p2) target bundleno = 510 (0x1fe), region = 52 }
 0x11a   : > { %v290_v46 = vadd.f32 %v289_v45, %v283_v44 }
 0x11c   : > { %291 = vst [vmem:[#allocation3] sm:$0x1] %v290_v46 }
 0x11d   : > { %vm328_vm1 = vcmask 1040384  }
 0x11e   : > { %v320_v49 = vld [vmem:[#allocation4] sm:$0x1] }
 0x11f   : > { %v312_v47 = vld [vmem:[#allocation2] sm:$0x1]  ;;  %v322_v53 = vmul.f32 %v320_v49, %v320_v49 }
 0x120   : > { %v314_v50 = vmul.f32 %v312_v47, %v312_v47 }
 0x123   : > { %v316_v48 = vld [vmem:[#allocation3] sm:$0x1] }
 0x124   : > { %v317_v51 = vadd.f32 %v316_v48, %v312_v47  ;;  %v318_v52 = vmul.f32 %v316_v48, %v316_v48 }
 0x126   : > { %v319_v54 = vadd.f32 %v318_v52, %v314_v50  ;;  %v321_v55 = vadd.f32 %v320_v49, %v317_v51 }
 0x128   : > { %v323_v56 = vadd.f32 %v322_v53, %v319_v54  ;;  %v324_v57 = vmul.f32 0.5, %v321_v55 }
 0x12a   : > { %v325_v58 = vmul.f32 %v324_v57, %v321_v55  ;;  %v326_v59 = vmul.f32 1.5, %v323_v56 }
 0x12c   : > { %v327_v60 = vsub.f32 %v325_v58, %v326_v59 }
 0x12e   : > { %v329_v61 = vsel %vm328_vm1, %v327_v60, 0.0 }
 0x12f   : > { %330 = vadd.xlane.f32.xlu0 %v329_v61 }
 0x1b8   : > { %v331_v62 = vpop.xlane.xlu0 %330 }
 0x1b9   : > { %v332_v63 = vrot.slane %v331_v62, 4 }
 0x1bb   : > { %v333_v0 = vadd.f32 %v332_v63, %v331_v62 }
 0x1bd   : > { %v334_v1 = vrot.slane %v333_v0, 2 }
 0x1bf   : > { %v335_v2 = vadd.f32 %v334_v1, %v333_v0 }
 0x1c1   : > { %v336_v3 = vrot.slane %v335_v2, 1 }
 0x1c3   : > { %v337_v4 = vadd.f32 %v336_v3, %v335_v2 }
 0x1c5   : > { %463 = vpush %v337_v4 }
 0x1f6   : > { %s464_s28 = spop %463 }
 0x1f7   : > { %s339_s29 = smul.f32 0.0069444445, %s464_s28 }
 0x1f9   : > { %s340_s12 = sadd.f32 3.0, %s339_s29 }
 0x1fb   : > { %s341_s4 = smul.f32 0.5, %s340_s12 }
 0x1fd   : > { %343 = sst [smem:[#allocation11]] %s341_s4 }
 0x1fe PF: > { %p486_p5 = scmp.eq.s32.totalorder %s710_s16, 1  ;;  %s670_s18 = smov [#allocation11]  }
 0x200   : > { %472 = dma.smem_to_hbm (%p486_p5), %s670_s18, 16, %s870_s3, [#allocation7]  }
 0x201   : > { %647 = dma.done.wait (%p486_p5), [#allocation7], 16  }
 0x202   : > { %649 = vsyncadd (%p486_p5), [#allocation7], 4294967280 }
 0x203   : > { %357 = sfence }
 0x204 PF: > { %p17_p6 = scmp.ge.s32.totalorder %s713_s17, 4   ;;  %s880_s12 = smov %s656_s13 }
 0x205   : > { %s881_s13 = smov %s660_s14  ;;  %s882_s14 = smov %s723_s20 }
 0x206   : > { %s883_s15 = smov %s713_s17  ;;  %19 = sbr.rel (!%p17_p6) target bundleno = 6 (0x6), region = 102 }
 0x20b   :  { %363 = vsyncpa [#allocation6], 1 }
 0x20c   :  { %365 = vsyncpa [#allocation6 + $0x1], 1 }
 0x20d   :  { %366 = vsyncpa [#allocation9], 1 }
 0x20e   :  { %368 = vsyncpa [#allocation9 + $0x1], 1 }
 0x20f   :  { %369 = vsyncpa [#allocation7], 1 }
 0x210   :  { %371 = vsyncpa [#allocation7 + $0x1], 1 }

</bundles_post_ra>
